<compile_context>
chip_gen: v7x
topology: tpu7x:2x2x1
jax: 0.10.0
libtpu: 0.0.40
codegen_flags: <defaults>
</compile_context>

<pallas_src>
import functools

import jax
import jax.numpy as jnp
from jax.experimental import pallas as pl
from jax.experimental.pallas import tpu as pltpu


_INV_SQRT2 = 0.7071067811865476


def _gelu_exact(x):
    # torch ACT2FN["gelu"] == exact erf GELU (computed in f32 on the slab).
    return 0.5 * x * (1.0 + jax.lax.erf(x * jnp.asarray(_INV_SQRT2, x.dtype)))


def gated_mlp_kernel(x_ref, w_ug_ref, w_dn_ref, b_ref, o_ref, acc_ref, *, ti):
    k = pl.program_id(1)

    @pl.when(k == 0)
    def _init():
        acc_ref[...] = jnp.zeros_like(acc_ref)

    x = x_ref[...]                                                    # (tm, H)
    # Fused up+gate projection: one MXU contraction -> (tm, 2*ti), f32 acc.
    ug = jnp.dot(x, w_ug_ref[...], preferred_element_type=jnp.float32)
    up = ug[:, :ti]
    gate = ug[:, ti:]
    gated = _gelu_exact(gate) * up                                    # (tm, ti) f32

    # Partial down-projection for this I-tile, accumulated in f32 VMEM.
    acc_ref[...] += jnp.dot(gated.astype(w_dn_ref.dtype), w_dn_ref[...],
                            preferred_element_type=jnp.float32)       # (tm, H)

    @pl.when(k == pl.num_programs(1) - 1)
    def _finalize():
        o_ref[...] = (acc_ref[...] + b_ref[...]).astype(o_ref.dtype)


def prepare_gated_mlp_weights(w_up_gate, w_down, *, ti=512):
    """One-time weight prep (do this at load time, NOT per forward call).

    w_up_gate: (2I, H) torch nn.Linear layout (first I out-features = up,
               last I = gate).  w_down: (H, I) torch layout.
    Returns (w_ug_packed (H, 2I) interleaved per-ti, w_down_t (I, H), ti).
    """
    I2, H = w_up_gate.shape
    I = I2 // 2
    ti = min(ti, I)
    if I % ti != 0:
        ti = I  # fallback for small/odd models; keeps a single clean I-tile
    kt = I // ti

    w_up_t = w_up_gate[:I, :].T        # (H, I)
    w_gate_t = w_up_gate[I:, :].T      # (H, I)
    # Interleave per ti-block: columns = [up_0 | gate_0 | up_1 | gate_1 | ...]
    w_ug_packed = jnp.concatenate(
        [w_up_t.reshape(H, kt, ti), w_gate_t.reshape(H, kt, ti)],
        axis=-1).reshape(H, 2 * I)
    w_down_t = w_down.T                # (I, H)
    return w_ug_packed, w_down_t, ti


def gated_mlp(x, w_ug_packed, w_down_t, b_down, *, tm=512, ti=512,
              compute_dtype=None):
    """x: (..., H); w_ug_packed: (H, 2I) from prepare_gated_mlp_weights;
    w_down_t: (I, H); b_down: (H,)."""
    orig_shape = x.shape
    out_dtype = x.dtype
    H = orig_shape[-1]
    I = w_down_t.shape[0]

    x2d = x.reshape(-1, H)
    M = x2d.shape[0]

    # Tile selection: big M tile for MXU utilization, clamped to the problem.
    tm = min(tm, M)
    if tm < M and tm % 8 != 0:
        tm = max(8, (tm // 8) * 8)
    ti = min(ti, I)
    if I % ti != 0:
        ti = I
    kt = I // ti

    b2d = b_down.reshape(1, H)

    # Optional reduced-precision matmul operands (bf16 on v6e/v7x).
    if compute_dtype is not None:
        x2d = x2d.astype(compute_dtype)
        w_ug_packed = w_ug_packed.astype(compute_dtype)
        w_down_t = w_down_t.astype(compute_dtype)

    itemsize = jnp.dtype(x2d.dtype).itemsize
    out_itemsize = jnp.dtype(out_dtype).itemsize

    # Explicit VMEM budget from the tiles (double-buffered ins/outs + f32 acc),
    # with 2x headroom, instead of the 16/32 MiB scoped defaults.
    in_bytes = 2 * (tm * H + H * 2 * ti + ti * H + H) * itemsize
    out_bytes = 2 * tm * H * out_itemsize
    acc_bytes = tm * H * 4
    vmem_limit = int(min(128 << 20, max(32 << 20,
                                        2 * (in_bytes + out_bytes + acc_bytes))))

    # Advisory cost model for the XLA scheduler.
    cost = pl.CostEstimate(
        flops=2 * M * H * (2 * I) + 2 * M * I * H,
        transcendentals=M * I,
        bytes_accessed=(M * H + H * 2 * I + I * H + H) * itemsize
                       + M * H * out_itemsize,
    )

    grid = (pl.cdiv(M, tm), kt)
    out = pl.pallas_call(
        functools.partial(gated_mlp_kernel, ti=ti),
        out_shape=jax.ShapeDtypeStruct((M, H), out_dtype),
        grid_spec=pltpu.PrefetchScalarGridSpec(
            num_scalar_prefetch=0,
            grid=grid,
            in_specs=[
                pl.BlockSpec((tm, H), lambda i, k: (i, 0)),        # x tile
                pl.BlockSpec((H, 2 * ti), lambda i, k: (0, k)),    # [up_k|gate_k]
                pl.BlockSpec((ti, H), lambda i, k: (k, 0)),        # W_down^T tile
                pl.BlockSpec((1, H), lambda i, k: (0, 0)),         # bias
            ],
            out_specs=pl.BlockSpec((tm, H), lambda i, k: (i, 0)),
            scratch_shapes=[pltpu.VMEM((tm, H), jnp.float32)],     # f32 accumulator
        ),
        compiler_params=pltpu.CompilerParams(
            dimension_semantics=("parallel", "arbitrary"),
            vmem_limit_bytes=vmem_limit),
        cost_estimate=cost,
    )(x2d, w_ug_packed, w_down_t, b2d)
    return out.reshape(orig_shape)


def reference(x, w_up_gate, w_down, b_down):
    I = w_up_gate.shape[0] // 2
    up_gate = x @ w_up_gate.T
    up, gate = up_gate[..., :I], up_gate[..., I:]
    gated = _gelu_exact(gate) * up
    return gated @ w_down.T + b_down


if __name__ == "__main__":
    # Small config consistent with NewConfig semantics.
    batch, seq = 2, 8
    hidden_size = 32
    intermediate_size = 64

    key = jax.random.PRNGKey(0)
    kx, k1, k2, k3 = jax.random.split(key, 4)

    x = jax.random.normal(kx, (batch, seq, hidden_size), dtype=jnp.float32)
    # Deterministic "initializer_range=0.02"-style params (torch layout).
    w_up_gate = 0.02 * jax.random.normal(
        k1, (2 * intermediate_size, hidden_size), dtype=jnp.float32)
    w_down = 0.02 * jax.random.normal(
        k2, (hidden_size, intermediate_size), dtype=jnp.float32)
    b_down = 0.02 * jax.random.normal(k3, (hidden_size,), dtype=jnp.float32)

    # One-time weight packing (load-time, not per forward).
    w_ug_packed, w_down_t, ti = prepare_gated_mlp_weights(
        w_up_gate, w_down, ti=512)

    out = gated_mlp(x, w_ug_packed, w_down_t, b_down, tm=512, ti=ti)
    out = jax.block_until_ready(out)

    ref = reference(x, w_up_gate, w_down, b_down)
    assert out.shape == (batch, seq, hidden_size)
    assert jnp.allclose(out, ref, atol=1e-5, rtol=1e-5), "mismatch vs reference"
    print("KERNEL_OK")
</pallas_src>

<mosaic_0001>
module attributes {stable_mosaic.version = 11 : i64} {
  func.func @gated_mlp_kernel(%arg0: i32, %arg1: i32, %arg2: memref<16x32xf32, #tpu.memory_space<vmem>>, %arg3: memref<32x128xf32, #tpu.memory_space<vmem>>, %arg4: memref<64x32xf32, #tpu.memory_space<vmem>>, %arg5: memref<1x32xf32, #tpu.memory_space<vmem>>, %arg6: memref<16x32xf32, #tpu.memory_space<vmem>>, %arg7: memref<16x32xf32, #tpu.memory_space<vmem>>) attributes {dimension_semantics = [#tpu.dimension_semantics<parallel>, #tpu.dimension_semantics<arbitrary>], iteration_bounds = array<i64: 1, 1>, scalar_prefetch = 0 : i64, scratch_operands = 1 : i64, tpu.core_type = #tpu.core_type<tc>, window_params = [{transform_indices = @transform_0, window_bounds = array<i64: 16, 32>}, {transform_indices = @transform_1, window_bounds = array<i64: 32, 128>}, {transform_indices = @transform_2, window_bounds = array<i64: 64, 32>}, {pipeline_mode = #tpu.pipeline_mode<synchronous>, transform_indices = @transform_3, window_bounds = array<i64: 1, 32>}, {transform_indices = @transform_4, window_bounds = array<i64: 16, 32>}]} {
    %c0_i32 = arith.constant 0 : i32
    %0 = arith.cmpi eq, %arg1, %c0_i32 : i32
    %1 = arith.extui %0 : i1 to i32
    %c0_i32_0 = arith.constant 0 : i32
    %2 = arith.cmpi ne, %1, %c0_i32_0 : i32
    scf.if %2 {
      %cst_16 = arith.constant 0.000000e+00 : f32
      %25 = vector.broadcast %cst_16 : f32 to vector<16x32xf32>
      %c0_17 = arith.constant 0 : index
      %c0_18 = arith.constant 0 : index
      %26 = vector.load %arg7[%c0_17, %c0_18] : memref<16x32xf32, #tpu.memory_space<vmem>>, vector<16x32xf32>
      tpu.vector_store %arg7[%c0_17, %c0_18], %25 {strides = array<i32>} : memref<16x32xf32, #tpu.memory_space<vmem>>, vector<16x32xf32>,
    } else {
    }
    %c0 = arith.constant 0 : index
    %c0_1 = arith.constant 0 : index
    %3 = vector.load %arg2[%c0, %c0_1] : memref<16x32xf32, #tpu.memory_space<vmem>>, vector<16x32xf32>
    %c0_2 = arith.constant 0 : index
    %c0_3 = arith.constant 0 : index
    %4 = vector.load %arg3[%c0_2, %c0_3] : memref<32x128xf32, #tpu.memory_space<vmem>>, vector<32x128xf32>
    %cst = arith.constant dense<0.000000e+00> : vector<16x128xf32>
    %5 = tpu.matmul %3, %4, %cst {dimension_numbers = #tpu.dot_dimension_numbers<[1], [0], [0], [1], [0, 0, 1, 1], [], []>} : vector<16x32xf32>, vector<32x128xf32>, vector<16x128xf32> -> vector<16x128xf32>
    %6 = vector.extract_strided_slice %5 {offsets = [0, 0], sizes = [16, 64], strides = [1, 1]} : vector<16x128xf32> to vector<16x64xf32>
    %7 = vector.extract_strided_slice %5 {offsets = [0, 64], sizes = [16, 64], strides = [1, 1]} : vector<16x128xf32> to vector<16x64xf32>
    %cst_4 = arith.constant 5.000000e-01 : f32
    %8 = vector.broadcast %cst_4 : f32 to vector<16x64xf32>
    %9 = arith.mulf %8, %7 : vector<16x64xf32>
    %cst_5 = arith.constant 0.707106769 : f32
    %10 = vector.broadcast %cst_5 : f32 to vector<16x64xf32>
    %11 = arith.mulf %7, %10 : vector<16x64xf32>
    %12 = math.erf %11 : vector<16x64xf32>
    %cst_6 = arith.constant 1.000000e+00 : f32
    %13 = vector.broadcast %cst_6 : f32 to vector<16x64xf32>
    %14 = arith.addf %13, %12 : vector<16x64xf32>
    %15 = arith.mulf %9, %14 : vector<16x64xf32>
    %16 = arith.mulf %15, %6 : vector<16x64xf32>
    %c0_7 = arith.constant 0 : index
    %c0_8 = arith.constant 0 : index
    %17 = vector.load %arg7[%c0_7, %c0_8] : memref<16x32xf32, #tpu.memory_space<vmem>>, vector<16x32xf32>
    %c0_9 = arith.constant 0 : index
    %c0_10 = arith.constant 0 : index
    %18 = vector.load %arg4[%c0_9, %c0_10] : memref<64x32xf32, #tpu.memory_space<vmem>>, vector<64x32xf32>
    %cst_11 = arith.constant dense<0.000000e+00> : vector<16x32xf32>
    %19 = tpu.matmul %16, %18, %cst_11 {dimension_numbers = #tpu.dot_dimension_numbers<[1], [0], [0], [1], [0, 0, 1, 1], [], []>} : vector<16x64xf32>, vector<64x32xf32>, vector<16x32xf32> -> vector<16x32xf32>
    %20 = arith.addf %17, %19 : vector<16x32xf32>
    %c0_12 = arith.constant 0 : index
    %c0_13 = arith.constant 0 : index
    %21 = vector.load %arg7[%c0_12, %c0_13] : memref<16x32xf32, #tpu.memory_space<vmem>>, vector<16x32xf32>
    tpu.vector_store %arg7[%c0_12, %c0_13], %20 {strides = array<i32>} : memref<16x32xf32, #tpu.memory_space<vmem>>, vector<16x32xf32>,
    %c0_i32_14 = arith.constant 0 : i32
    %22 = arith.cmpi eq, %arg1, %c0_i32_14 : i32
    %23 = arith.extui %22 : i1 to i32
    %c0_i32_15 = arith.constant 0 : i32
    %24 = arith.cmpi ne, %23, %c0_i32_15 : i32
    scf.if %24 {
      %c0_16 = arith.constant 0 : index
      %c0_17 = arith.constant 0 : index
      %25 = vector.load %arg7[%c0_16, %c0_17] : memref<16x32xf32, #tpu.memory_space<vmem>>, vector<16x32xf32>
      %c0_18 = arith.constant 0 : index
      %c0_19 = arith.constant 0 : index
      %26 = vector.load %arg5[%c0_18, %c0_19] : memref<1x32xf32, #tpu.memory_space<vmem>>, vector<1x32xf32>
      %27 = vector.broadcast %26 : vector<1x32xf32> to vector<16x32xf32>
      %28 = arith.addf %25, %27 : vector<16x32xf32>
      %c0_20 = arith.constant 0 : index
      %c0_21 = arith.constant 0 : index
      %29 = vector.load %arg6[%c0_20, %c0_21] : memref<16x32xf32, #tpu.memory_space<vmem>>, vector<16x32xf32>
      tpu.vector_store %arg6[%c0_20, %c0_21], %28 {strides = array<i32>} : memref<16x32xf32, #tpu.memory_space<vmem>>, vector<16x32xf32>,
    } else {
    }
    return
  }
  func.func @transform_0(%arg0: i32, %arg1: i32) -> (i32, i32) {
    %c0_i32 = arith.constant 0 : i32
    %c0_i32_0 = arith.constant 0 : i32
    return %arg0, %c0_i32 : i32, i32
  }
  func.func @transform_1(%arg0: i32, %arg1: i32) -> (i32, i32) {
    %c0_i32 = arith.constant 0 : i32
    %c0_i32_0 = arith.constant 0 : i32
    return %c0_i32, %arg1 : i32, i32
  }
  func.func @transform_2(%arg0: i32, %arg1: i32) -> (i32, i32) {
    %c0_i32 = arith.constant 0 : i32
    %c0_i32_0 = arith.constant 0 : i32
    return %arg1, %c0_i32 : i32, i32
  }
  func.func @transform_3(%arg0: i32, %arg1: i32) -> (i32, i32) {
    %c0_i32 = arith.constant 0 : i32
    %c0_i32_0 = arith.constant 0 : i32
    %c0_i32_1 = arith.constant 0 : i32
    return %c0_i32, %c0_i32_0 : i32, i32
  }
  func.func @transform_4(%arg0: i32, %arg1: i32) -> (i32, i32) {
    %c0_i32 = arith.constant 0 : i32
    %c0_i32_0 = arith.constant 0 : i32
    return %arg0, %c0_i32 : i32, i32
  }
}

</mosaic_0001>

<bundles_post_ra>
// kernel: tpu_custom_call.1
= control target key start
LH: loop header
LB: loop body
LE: loop exit
PB: predicated region body
PF: predicated region fallthrough
CT: control target
= control target key end

     0   :  { %vm22_vm0 = vcmask 261120   ;;  %s472_s0 = inlined_call_operand.vmem [shape: f32[16,32], index: 0, kind: input, shape index: {}]   ;;  %s473_s1 = inlined_call_operand.vmem [shape: f32[32,128], index: 1, kind: input, shape index: {}]   ;;  %s474_s2 = inlined_call_operand.vmem [shape: f32[64,32], index: 2, kind: input, shape index: {}]   ;;  %s475_s3 = inlined_call_operand.vmem [shape: f32[1,32], index: 3, kind: input, shape index: {}]   ;;  %s476_s4 = inlined_call_operand.hbm [shape: f32[16,32], index: 4, kind: output, shape index: {}]  }
   0x1   :  { %v27_v0 = vld [vmem:[%s473_s1] sm:$0xff]  ;;  %v28_v1 = vld [vmem:[%s473_s1 + $0x8] sm:$0xff]  ;;  %v29_v2 = vld [vmem:[%s473_s1 + $0x10] sm:$0xff] }
   0x2   :  { %v316_v3 = vpack.c.bf16 %v28_v1, %v27_v0  ;;  %v30_v4 = vld [vmem:[%s473_s1 + $0x18] sm:$0xff]  ;;  %v25_v5 = vld [vmem:[%s472_s0] sm:$0xff] }
   0x3   :  { %v320_v6 = vpack.c.bf16 %v30_v4, %v29_v2  ;;  %294 = vmatprep.mubr.msk.f32.mxu0 %vm22_vm0, %v25_v5 }
   0x4   :  { %9 = vsyncpa [#allocation4], 0  ;;  %317 = vmatprep.subr.bf16.mxu0 %v316_v3  ;;  %v26_v7 = vld [vmem:[%s472_s0 + $0x8] sm:$0xff]  ;;  %v135_v8 = vld [vmem:[%s474_s2] sm:$0xff]  ;;  %s373_s11 = smov 64   ;;  %v374_v26 = vmov 0.0  }
   0x5   :  { %319 = vmatpush3.bf16.msra.mxu0 %v316_v3  ;;  %v136_v9 = vld [vmem:[%s474_s2 + $0x8] sm:$0xff]  ;;  %v137_v10 = vld [vmem:[%s474_s2 + $0x10] sm:$0xff]  ;;  %v138_v12 = vld [vmem:[%s474_s2 + $0x18] sm:$0xff]  ;;  %24 = vst.msk [vmem:[#allocation2 + $0x8] sm:$0xff] %vm22_vm0, %v374_v26  ;;  %vm149_vm1 = vcmask 523264   ;;  %s375_s17 = smov [#allocation3]  }
   0x6   :  { %321 = vmatprep.subr.bf16.mxu0 %v320_v6  ;;  %v324_v11 = vpack.c.bf16 %v136_v9, %v135_v8  ;;  %v328_v13 = vpack.c.bf16 %v138_v12, %v137_v10  ;;  %v139_v14 = vld [vmem:[%s474_s2 + $0x20] sm:$0xff]  ;;  %v140_v15 = vld [vmem:[%s474_s2 + $0x28] sm:$0xff]  ;;  %v141_v21 = vld [vmem:[%s474_s2 + $0x30] sm:$0xff]  ;;  %23 = vst.msk [vmem:[#allocation2] sm:$0xff] %vm22_vm0, %v374_v26  ;;  %s254_s18 = sshll.u32 %s375_s17, 4  ;;  %s255_s18 = int_to_ptr.vmem [resolvable:$true] %s254_s18 }
   0x7   :  { %v332_v17 = vpack.c.bf16 %v140_v15, %v139_v14  ;;  %v142_v22 = vld [vmem:[%s474_s2 + $0x38] sm:$0xff]  ;;  %v269_v45 = vld [vmem:[%s475_s3] ss:$0 sm:$0xff]  ;;  %s349_s19 = scalar_lea.vmem %s255_s18, 256  ;;  %p354_p1 = scmp.lt.s32.totalorder %s255_s18, %s255_s18 }
   0x8   :  { %325 = vmatprep.subr.bf16.mxu1 %v324_v11  ;;  %v336_v23 = vpack.c.bf16 %v142_v22, %v141_v21  ;;  %p350_p0 = scmp.ne.s32.totalorder %s255_s18, %s349_s19  ;;  %p355_p2 = scmp.lt.s32.totalorder %s349_s19, %s349_s19 }
   0x9   :  { %323 = vmatpush3.bf16.msra.mxu0 %v320_v6  ;;  %327 = vmatpush3.bf16.msra.mxu1 %v324_v11 }
   0xa   :  { %329 = vmatprep.subr.bf16.mxu1 %v328_v13  ;;  %p356_p3 = por %p355_p2, %p354_p1 }
   0xc   :  { %295 = vmatmul.mubr.msk.f32.vlgmr.msra.gmra.mrb[0].mxu0 %vm22_vm0, %v26_v7  ;;  %v134_v39 = vld [vmem:[#allocation2 + $0x8] sm:$0xff]  ;;  %p357_p4 = pnand %p356_p3, %p350_p0 }
   0xd   :  { %331 = vmatpush3.bf16.msra.mxu1 %v328_v13  ;;  %v133_v40 = vld [vmem:[#allocation2] sm:$0xff] }
   0xe   :  { %333 = vmatprep.subr.bf16.mxu1 %v332_v17 }
  0x11   :  { %335 = vmatpush3.bf16.msra.mxu1 %v332_v17 }
  0x12   :  { %337 = vmatprep.subr.bf16.mxu1 %v336_v23 }
  0x15   :  { %339 = vmatpush3.bf16.msra.mxu1 %v336_v23 }
  0xdf   :  { %v296_v16 = vpop.f32.mrb[0].mxu0 }
  0xe0   :  { %v104_v18 = vpop.f32.mrb[1].mxu0  ;;  %v116_v20 = vmul.f32 0.70710677, %v296_v16  ;;  %v114_v32 = vmul.f32 0.5, %v296_v16 }
  0xe1   :  { %125 = vrot.lane.b32.xlu0 %v104_v18, %s373_s11  ;;  %v115_v19 = vmul.f32 0.70710677, %v104_v18  ;;  %v113_v28 = vmul.f32 0.5, %v104_v18 }
  0xe3   :  { %345 = verf.f32 %v115_v19 }
  0xe4   :  { %347 = verf.f32 %v116_v20 }
  0xe5   :  { %127 = vrot.lane.b32.xlu0 %v296_v16, %s373_s11 }
  0xed   :  { %v346_v24 = vpop.eup %345 }
  0xee   :  { %v119_v25 = vadd.f32 1.0, %v346_v24  ;;  %v348_v27 = vpop.eup %347 }
  0xef   :  { %v120_v30 = vadd.f32 1.0, %v348_v27 }
  0xf0   :  { %v121_v29 = vmul.f32 %v119_v25, %v113_v28 }
  0xf1   :  { %v122_v34 = vmul.f32 %v120_v30, %v114_v32 }
 0x153   :  { %v126_v31 = vpop.permute.xlu0 %125 }
 0x154   :  { %v131_v33 = vmul.f32 %v126_v31, %v121_v29 }
 0x156   :  { %145 = vrot.lane.b32.xlu1 %v131_v33, %s373_s11 }
 0x157   :  { %v128_v35 = vpop.permute.xlu0 %127 }
 0x158   :  { %v132_v36 = vmul.f32 %v128_v35, %v122_v34 }
 0x15a   :  { %147 = vrot.lane.b32.xlu1 %v132_v36, %s373_s11 }
 0x1c8   :  { %v146_v37 = vpop.permute.xlu1 %145 }
 0x1c9   :  { %313 = vmatprep.mubr.msk.f32.mxu1 %vm149_vm1, %v146_v37 }
 0x1cc   :  { %v148_v38 = vpop.permute.xlu1 %147 }
 0x1cd   :  { %314 = vmatmul.mubr.msk.f32.vlgmr.msra.gmra.mrb[0].mxu1 %vm149_vm1, %v148_v38 }
 0x2a0   :  { %v315_v41 = vpop.f32.mrb[0].mxu1 }
 0x2a1   :  { %v230_v42 = vadd.f32 %v315_v41, %v134_v39  ;;  %v220_v43 = vpop.f32.mrb[1].mxu1 }
 0x2a2   :  { %v229_v44 = vadd.f32 %v220_v43, %v133_v40 }
 0x2a3   :  { %232 = vst.msk [vmem:[#allocation2 + $0x8] sm:$0xff] %vm22_vm0, %v230_v42 }
 0x2a4   :  { %231 = vst.msk [vmem:[#allocation2] sm:$0xff] %vm22_vm0, %v229_v44 }
 0x2aa   :  { %v237_v46 = vld [vmem:[#allocation2 + $0x8] sm:$0xff] }
 0x2ab   :  { %v236_v47 = vld [vmem:[#allocation2] sm:$0xff]  ;;  %v246_v48 = vadd.f32 %v269_v45, %v237_v46 }
 0x2ac   :  { %v245_v49 = vadd.f32 %v269_v45, %v236_v47 }
 0x2ad   :  { %248 = vst.msk [vmem:[#allocation3 + $0x8] sm:$0xff] %vm22_vm0, %v246_v48 }
 0x2ae   :  { %247 = vst.msk [vmem:[#allocation3] sm:$0xff] %vm22_vm0, %v245_v49 }
 0x2af   :  { %360 = shalt.err (!%p357_p4)
}
 0x2b0   :  { %s361_s21 = scalar_lea.hbm %s476_s4, 256 }
 0x2b1   :  { %p362_p5 = scmp.ne.s32.totalorder %s476_s4, %s361_s21  ;;  %p365_p6 = scmp.lt.u32.totalorder %s361_s21, %s476_s4 }
 0x2b3   :  { %p367_p7 = pnand %p365_p6, %p362_p5 }
 0x2b5   :  { %370 = shalt.err (!%p367_p7)
}
 0x2b6   :  { %s376_s26 = smov 128   ;;  %s377_s27 = smov 8  }
 0x2b7   :  { %260 = dma.vmem_to_hbm [thread:$0]  %s255_s18, 256, %s476_s4, [#allocation4], %s376_s26, %s376_s26, %s377_s27  }
 0x2b8   :  { %371 = dma.done.wait [#allocation4], 256  }
 0x2b9   :  { %372 = vsyncadd [#allocation4], 4294967040 }
 0x2ba   :  { %264 = vsyncpa [#allocation4], 1 }

</bundles_post_ra>
